<compile_context>
chip_gen: v6e
topology: v6e:2x2x1
jax: 0.10.0
libtpu: 0.0.40
codegen_flags: <defaults>
</compile_context>

<pallas_src>
import functools
import math

import jax
import jax.numpy as jnp
from jax import lax
from jax.experimental import pallas as pl
from jax.experimental.pallas import tpu as pltpu


def _attend(q, k, v, m, out_ref, attn_ref, scale):
    """Shared body: q (tq,dk), k (Sk,dk), v (Sk,dv), m (tq,Sk) int32 or None."""
    qf = q.astype(jnp.float32) * jnp.float32(scale)   # scale on the small side
    kf = k.astype(jnp.float32)
    vf = v.astype(jnp.float32)

    # scores = (Q*scale) @ K^T : MXU matmul, f32 accumulation, contraction over
    # the last axis of both operands (no in-VMEM transpose of K).
    scores = lax.dot_general(
        qf, kf,
        dimension_numbers=(((1,), (1,)), ((), ())),
        preferred_element_type=jnp.float32,
    )

    if m is not None:
        scores = jnp.where(m == 0, jnp.float32(-1e9), scores)

    # Numerically stable softmax over the key axis.
    s_max = jnp.max(scores, axis=-1, keepdims=True)        # XLU reduce
    e = jnp.exp(scores - s_max)                             # EUP
    denom = jnp.sum(e, axis=-1, keepdims=True)              # XLU reduce
    p = e * pl.reciprocal(denom, approx=True)               # EUP recip + VPU mul
    attn_ref[...] = p.astype(attn_ref.dtype)

    # TODO(synk): training-mode dropout on p_attn (pltpu.prng_seed +
    # pltpu.stateful_bernoulli) is not applied; forward matches eval()/p=0.

    # out = P @ V : MXU matmul, f32 accumulation.
    out = jnp.dot(p, vf, preferred_element_type=jnp.float32)
    out_ref[...] = out.astype(out_ref.dtype)


def _sdpa_kernel_masked(q_ref, k_ref, v_ref, m_ref, out_ref, attn_ref, *, scale):
    _attend(q_ref[...], k_ref[...], v_ref[...], m_ref[...], out_ref, attn_ref, scale)


def _sdpa_kernel_nomask(q_ref, k_ref, v_ref, out_ref, attn_ref, *, scale):
    _attend(q_ref[...], k_ref[...], v_ref[...], None, out_ref, attn_ref, scale)


def _pick_row_tile(seq_q):
    """Largest query-row tile that needs no padding and stays layout-legal."""
    if seq_q <= 256:
        return seq_q                     # full-extent block is always legal
    for t in (256, 128, 64, 32, 16, 8):
        if seq_q % t == 0:
            return t
    return seq_q                         # ragged seq_q: one full block


def scaled_dot_product_attention(query, key, value, mask=None, dropout_rate=0.0):
    """query: (..., Sq, d_k); key: (..., Sk, d_k); value: (..., Sk, d_v);
    mask: broadcastable to (..., Sq, Sk) or None.  Returns (output, p_attn)."""
    *lead, sq, dk = query.shape
    lead = tuple(lead)
    sk = key.shape[-2]
    dv = value.shape[-1]
    bh = 1
    for d in lead:
        bh *= d

    q3 = query.reshape(bh, sq, dk)
    k3 = key.reshape(bh, sk, dk)
    v3 = value.reshape(bh, sk, dv)

    del dropout_rate  # eval-mode forward: dropout is the identity (see TODO)

    tq = _pick_row_tile(sq)
    grid = (bh, sq // tq)
    scale = 1.0 / math.sqrt(dk)

    # Common specs (batch*heads axis squeezed out of the kernel refs).
    q_spec = pl.BlockSpec((None, tq, dk), lambda b, i: (b, i, 0))
    k_spec = pl.BlockSpec((None, sk, dk), lambda b, i: (b, 0, 0))
    v_spec = pl.BlockSpec((None, sk, dv), lambda b, i: (b, 0, 0))
    out_specs = [
        pl.BlockSpec((None, tq, dv), lambda b, i: (b, i, 0)),  # output
        pl.BlockSpec((None, tq, sk), lambda b, i: (b, i, 0)),  # p_attn
    ]
    out_shape = (
        jax.ShapeDtypeStruct((bh, sq, dv), query.dtype),
        jax.ShapeDtypeStruct((bh, sq, sk), query.dtype),
    )
    cparams = pltpu.CompilerParams(dimension_semantics=("parallel", "parallel"))

    if mask is None:
        kernel = functools.partial(_sdpa_kernel_nomask, scale=scale)
        out, p_attn = pl.pallas_call(
            kernel,
            out_shape=out_shape,
            grid_spec=pltpu.PrefetchScalarGridSpec(
                num_scalar_prefetch=0,
                grid=grid,
                in_specs=[q_spec, k_spec, v_spec],
                out_specs=out_specs,
            ),
            compiler_params=cparams,
        )(q3, k3, v3)
    else:
        m = jnp.asarray(mask).astype(jnp.int32)
        # Normalize to ndim == len(lead) + 2, broadcast the trailing dims.
        while m.ndim < len(lead) + 2:
            m = m[None]
        m = jnp.broadcast_to(m, m.shape[:-2] + (sq, sk))
        lead_m = m.shape[:-2]
        if all(d == 1 for d in lead_m):
            # Single mask shared by every (batch, head): never duplicate it.
            mask3 = m.reshape(1, sq, sk)
            m_spec = pl.BlockSpec((None, tq, sk), lambda b, i: (0, i, 0))
        else:
            mask3 = jnp.broadcast_to(m, lead + (sq, sk)).reshape(bh, sq, sk)
            m_spec = pl.BlockSpec((None, tq, sk), lambda b, i: (b, i, 0))

        kernel = functools.partial(_sdpa_kernel_masked, scale=scale)
        out, p_attn = pl.pallas_call(
            kernel,
            out_shape=out_shape,
            grid_spec=pltpu.PrefetchScalarGridSpec(
                num_scalar_prefetch=0,
                grid=grid,
                in_specs=[q_spec, k_spec, v_spec, m_spec],
                out_specs=out_specs,
            ),
            compiler_params=cparams,
        )(q3, k3, v3, mask3)

    return out.reshape(lead + (sq, dv)), p_attn.reshape(lead + (sq, sk))


def _reference(q, k, v, mask, d_k):
    scores = jnp.einsum("bhqd,bhkd->bhqk", q, k, precision="highest") / math.sqrt(d_k)
    if mask is not None:
        scores = jnp.where(mask == 0, jnp.float32(-1e9), scores)
    p_ref = jax.nn.softmax(scores, axis=-1)
    out_ref = jnp.einsum("bhqk,bhkd->bhqd", p_ref, v, precision="highest")
    return out_ref, p_ref


if __name__ == "__main__":
    # Small shapes consistent with the module: batch=2, heads=4, seq=8, d_k=32.
    batch, heads, seq, d_k = 2, 4, 8, 32
    root = jax.random.PRNGKey(0)
    kq, kk, kv = jax.random.split(root, 3)
    q = jax.random.normal(kq, (batch, heads, seq, d_k), dtype=jnp.float32)
    k = jax.random.normal(kk, (batch, heads, seq, d_k), dtype=jnp.float32)
    v = jax.random.normal(kv, (batch, heads, seq, d_k), dtype=jnp.float32)

    # Causal mask, broadcast over batch and heads (mask == 0 positions blocked).
    mask = jnp.tril(jnp.ones((seq, seq), dtype=jnp.int32))[None, None]  # (1,1,S,S)

    # Masked path.
    out, p_attn = scaled_dot_product_attention(q, k, v, mask, dropout_rate=0.0)
    out = jax.block_until_ready(out)
    p_attn = jax.block_until_ready(p_attn)

    out_ref, p_ref = _reference(q, k, v, mask, d_k)
    assert out.shape == (batch, heads, seq, d_k)
    assert p_attn.shape == (batch, heads, seq, seq)
    # Tolerance leaves headroom for MXU matmul passes / approx reciprocal.
    assert jnp.allclose(p_attn, p_ref, atol=2e-2, rtol=2e-2)
    assert jnp.allclose(out, out_ref, atol=2e-2, rtol=2e-2)

    # No-mask path (mask is None in the module is also legal).
    out_nm, p_nm = scaled_dot_product_attention(q, k, v, None, dropout_rate=0.0)
    out_nm = jax.block_until_ready(out_nm)
    out_ref_nm, p_ref_nm = _reference(q, k, v, None, d_k)
    assert jnp.allclose(p_nm, p_ref_nm, atol=2e-2, rtol=2e-2)
    assert jnp.allclose(out_nm, out_ref_nm, atol=2e-2, rtol=2e-2)

    print("KERNEL_OK")
</pallas_src>

<mosaic_0001>
module attributes {stable_mosaic.version = 11 : i64} {
  func.func @_sdpa_kernel_masked(%arg0: i32, %arg1: i32, %arg2: memref<1x8x32xf32, #tpu.memory_space<vmem>>, %arg3: memref<1x8x32xf32, #tpu.memory_space<vmem>>, %arg4: memref<1x8x32xf32, #tpu.memory_space<vmem>>, %arg5: memref<1x8x8xi32, #tpu.memory_space<vmem>>, %arg6: memref<1x8x32xf32, #tpu.memory_space<vmem>>, %arg7: memref<1x8x8xf32, #tpu.memory_space<vmem>>) attributes {dimension_semantics = [#tpu.dimension_semantics<parallel>, #tpu.dimension_semantics<parallel>], iteration_bounds = array<i64: 8, 1>, scalar_prefetch = 0 : i64, scratch_operands = 0 : i64, tpu.core_type = #tpu.core_type<tc>, window_params = [{transform_indices = @transform_0, window_bounds = array<i64: 1, 8, 32>}, {transform_indices = @transform_1, window_bounds = array<i64: 1, 8, 32>}, {transform_indices = @transform_2, window_bounds = array<i64: 1, 8, 32>}, {transform_indices = @transform_3, window_bounds = array<i64: 1, 8, 8>}, {transform_indices = @transform_4, window_bounds = array<i64: 1, 8, 32>}, {transform_indices = @transform_5, window_bounds = array<i64: 1, 8, 8>}]} {
    %c0 = arith.constant 0 : index
    %c0_0 = arith.constant 0 : index
    %c0_1 = arith.constant 0 : index
    %0 = vector.load %arg2[%c0, %c0_0, %c0_1] : memref<1x8x32xf32, #tpu.memory_space<vmem>>, vector<1x8x32xf32>
    %1 = vector.shape_cast %0 : vector<1x8x32xf32> to vector<8x32xf32>
    %c0_2 = arith.constant 0 : index
    %c0_3 = arith.constant 0 : index
    %c0_4 = arith.constant 0 : index
    %2 = vector.load %arg3[%c0_2, %c0_3, %c0_4] : memref<1x8x32xf32, #tpu.memory_space<vmem>>, vector<1x8x32xf32>
    %3 = vector.shape_cast %2 : vector<1x8x32xf32> to vector<8x32xf32>
    %c0_5 = arith.constant 0 : index
    %c0_6 = arith.constant 0 : index
    %c0_7 = arith.constant 0 : index
    %4 = vector.load %arg4[%c0_5, %c0_6, %c0_7] : memref<1x8x32xf32, #tpu.memory_space<vmem>>, vector<1x8x32xf32>
    %5 = vector.shape_cast %4 : vector<1x8x32xf32> to vector<8x32xf32>
    %c0_8 = arith.constant 0 : index
    %c0_9 = arith.constant 0 : index
    %c0_10 = arith.constant 0 : index
    %6 = vector.load %arg5[%c0_8, %c0_9, %c0_10] : memref<1x8x8xi32, #tpu.memory_space<vmem>>, vector<1x8x8xi32>
    %7 = vector.shape_cast %6 : vector<1x8x8xi32> to vector<8x8xi32>
    %cst = arith.constant 0.176776692 : f32
    %8 = vector.broadcast %cst : f32 to vector<8x32xf32>
    %9 = arith.mulf %1, %8 : vector<8x32xf32>
    %cst_11 = arith.constant dense<0.000000e+00> : vector<8x8xf32>
    %10 = tpu.matmul %9, %3, %cst_11 {dimension_numbers = #tpu.dot_dimension_numbers<[1], [1], [0], [0], [0, 0, 1, 0], [], []>} : vector<8x32xf32>, vector<8x32xf32>, vector<8x8xf32> -> vector<8x8xf32>
    %c0_i32 = arith.constant 0 : i32
    %11 = vector.broadcast %c0_i32 : i32 to vector<8x8xi32>
    %12 = arith.cmpi eq, %7, %11 : vector<8x8xi32>
    %cst_12 = arith.constant -1.000000e+09 : f32
    %13 = vector.broadcast %cst_12 : f32 to vector<8x8xf32>
    %14 = arith.select %12, %13, %10 : vector<8x8xi1>, vector<8x8xf32>
    %cst_13 = arith.constant dense<0xFF800000> : vector<8xf32>
    %15 = vector.multi_reduction <maximumf>, %14, %cst_13 [1] : vector<8x8xf32> to vector<8xf32>
    %16 = vector.shape_cast %15 : vector<8xf32> to vector<8x1xf32>
    %17 = vector.broadcast %16 : vector<8x1xf32> to vector<8x8xf32>
    %18 = arith.subf %14, %17 : vector<8x8xf32>
    %19 = math.exp %18 : vector<8x8xf32>
    %cst_14 = arith.constant dense<0.000000e+00> : vector<8xf32>
    %20 = vector.multi_reduction <add>, %19, %cst_14 [1] : vector<8x8xf32> to vector<8xf32>
    %21 = vector.shape_cast %20 : vector<8xf32> to vector<8x1xf32>
    %22 = tpu.reciprocal %21 {approx = true} : vector<8x1xf32> -> vector<8x1xf32>
    %23 = vector.broadcast %22 : vector<8x1xf32> to vector<8x8xf32>
    %24 = arith.mulf %19, %23 : vector<8x8xf32>
    %c0_15 = arith.constant 0 : index
    %c0_16 = arith.constant 0 : index
    %c0_17 = arith.constant 0 : index
    %25 = vector.load %arg7[%c0_15, %c0_16, %c0_17] : memref<1x8x8xf32, #tpu.memory_space<vmem>>, vector<1x8x8xf32>
    %26 = vector.shape_cast %25 : vector<1x8x8xf32> to vector<8x8xf32>
    %27 = vector.shape_cast %24 : vector<8x8xf32> to vector<1x8x8xf32>
    tpu.vector_store %arg7[%c0_15, %c0_16, %c0_17], %27 {strides = array<i32>} : memref<1x8x8xf32, #tpu.memory_space<vmem>>, vector<1x8x8xf32>,
    %cst_18 = arith.constant dense<0.000000e+00> : vector<8x32xf32>
    %28 = tpu.matmul %24, %5, %cst_18 {dimension_numbers = #tpu.dot_dimension_numbers<[1], [0], [0], [1], [0, 0, 1, 1], [], []>} : vector<8x8xf32>, vector<8x32xf32>, vector<8x32xf32> -> vector<8x32xf32>
    %c0_19 = arith.constant 0 : index
    %c0_20 = arith.constant 0 : index
    %c0_21 = arith.constant 0 : index
    %29 = vector.load %arg6[%c0_19, %c0_20, %c0_21] : memref<1x8x32xf32, #tpu.memory_space<vmem>>, vector<1x8x32xf32>
    %30 = vector.shape_cast %29 : vector<1x8x32xf32> to vector<8x32xf32>
    %31 = vector.shape_cast %28 : vector<8x32xf32> to vector<1x8x32xf32>
    tpu.vector_store %arg6[%c0_19, %c0_20, %c0_21], %31 {strides = array<i32>} : memref<1x8x32xf32, #tpu.memory_space<vmem>>, vector<1x8x32xf32>,
    return
  }
  func.func @transform_0(%arg0: i32, %arg1: i32) -> (i32, i32, i32) {
    %c0_i32 = arith.constant 0 : i32
    %c0_i32_0 = arith.constant 0 : i32
    return %arg0, %arg1, %c0_i32 : i32, i32, i32
  }
  func.func @transform_1(%arg0: i32, %arg1: i32) -> (i32, i32, i32) {
    %c0_i32 = arith.constant 0 : i32
    %c0_i32_0 = arith.constant 0 : i32
    %c0_i32_1 = arith.constant 0 : i32
    return %arg0, %c0_i32, %c0_i32_0 : i32, i32, i32
  }
  func.func @transform_2(%arg0: i32, %arg1: i32) -> (i32, i32, i32) {
    %c0_i32 = arith.constant 0 : i32
    %c0_i32_0 = arith.constant 0 : i32
    %c0_i32_1 = arith.constant 0 : i32
    return %arg0, %c0_i32, %c0_i32_0 : i32, i32, i32
  }
  func.func @transform_3(%arg0: i32, %arg1: i32) -> (i32, i32, i32) {
    %c0_i32 = arith.constant 0 : i32
    %c0_i32_0 = arith.constant 0 : i32
    %c0_i32_1 = arith.constant 0 : i32
    return %c0_i32, %arg1, %c0_i32_0 : i32, i32, i32
  }
  func.func @transform_4(%arg0: i32, %arg1: i32) -> (i32, i32, i32) {
    %c0_i32 = arith.constant 0 : i32
    %c0_i32_0 = arith.constant 0 : i32
    return %arg0, %arg1, %c0_i32 : i32, i32, i32
  }
  func.func @transform_5(%arg0: i32, %arg1: i32) -> (i32, i32, i32) {
    %c0_i32 = arith.constant 0 : i32
    %c0_i32_0 = arith.constant 0 : i32
    return %arg0, %arg1, %c0_i32 : i32, i32, i32
  }
}

</mosaic_0001>

<bundles_post_ra>
// kernel: tpu_custom_call.1
= control target key start
LH: loop header
LB: loop body
LE: loop exit
PB: predicated region body
PF: predicated region fallthrough
CT: control target
= control target key end

     0   :  { %s1392_s0 = inlined_call_operand.hbm [shape: f32[8,8,32], index: 0, kind: input, shape index: {}]   ;;  %s1393_s1 = inlined_call_operand.hbm [shape: f32[8,8,32], index: 1, kind: input, shape index: {}]   ;;  %s1394_s2 = inlined_call_operand.hbm [shape: f32[8,8,32], index: 2, kind: input, shape index: {}]   ;;  %s1395_s3 = inlined_call_operand.hbm [shape: s32[1,8,8], index: 3, kind: input, shape index: {}]   ;;  %s1396_s4 = inlined_call_operand.hbm [shape: f32[8,8,32], index: 4, kind: output, shape index: {0}]   ;;  %s1397_s5 = inlined_call_operand.hbm [shape: f32[8,8,8], index: 5, kind: output, shape index: {1}]  }
   0x1   :  { %1406 = sst [smem:[#allocation21_spill]] %s1393_s1 }
   0x2   :  { %11 = vsyncpa [#allocation3], 0 }
   0x3   :  { %13 = vsyncpa [#allocation3 + $0x1], 0 }
   0x4   :  { %14 = vsyncpa [#allocation6], 0 }
   0x5   :  { %16 = vsyncpa [#allocation6 + $0x1], 0 }
   0x6   :  { %17 = vsyncpa [#allocation9], 0 }
   0x7   :  { %18 = vsyncpa [#allocation4], 0 }
   0x8   :  { %20 = vsyncpa [#allocation4 + $0x1], 0 }
   0x9   :  { %21 = vsyncpa [#allocation12], 0 }
   0xa   :  { %23 = vsyncpa [#allocation12 + $0x1], 0  ;;  %s1137_s18 = smov 0   ;;  %s1139_s19 = smov 0  }
   0xb   :  { %s1141_s20 = smov 0   ;;  %s1143_s21 = smov 0  }
   0xc   :  { %s1145_s22 = smov 0   ;;  %s1147_s23 = smov 0  }
   0xd LB: > { %1407 = sst [smem:[#allocation18_spill]] %s1093_s22  ;;  %s41_s24 = sadd.s32 1, %s1093_s22  ;;  %s1097_s23 = sphi %s1147_s23, %s29_s23   ;;  %s1093_s22 = sphi %s1145_s22, %s1427_s22   ;;  %s1089_s21 = sphi %s1143_s21, %s1426_s21   ;;  %s1085_s20 = sphi %s1141_s20, %s1430_s20   ;;  %s1081_s19 = sphi %s1139_s19, %s1429_s19   ;;  %s1077_s18 = sphi %s1137_s18, %s1428_s18  }
   0xe   : > { %s50_s25 = sadd.s32 1, %s1085_s20  ;;  %p43_p0 = scmp.ge.s32.totalorder %s41_s24, 8 }
   0xf   : > { %p57_p1 = scmp.ne.s32.totalorder %s1085_s20, %s1081_s19  ;;  %p58_p2 = scmp.eq.s32.totalorder %s1097_s23, 0 }
  0x10   : > { %s1432_s24 = smov (%p43_p0, %s41_s24), 0  ;;  %p811_p4 = scmp.lt.s32.totalorder %s1097_s23, 8 }
  0x11   : > { %1408 = sst [smem:[#allocation19_spill]] %s1432_s24  ;;  %p59_p3 = por %p58_p2, %p57_p1 }
  0x12   : > { %s45_s26 = ssub.s32 %s1093_s22, %s1432_s24  ;;  %s1398_s27 = sand.u32 1, %s1085_s20  }
  0x13   : > { %p48_p5 = scmp.eq.s32.totalorder %s45_s26, 0  ;;  %s1183_s28 = sshll.u32 %s1398_s27, 3 }
  0x14   : > { %s1186_s29 = sshll.u32 %s1093_s22, 7  ;;  %p1188_p6 = pnand %p811_p4, %p59_p3 }
  0x15   : > { %s1193_s6 = scalar_select %p48_p5, %s1085_s20, %s50_s25  }
  0x16   : > { %s253_s7 = sand.u32 1, %s1097_s23   ;;  %s1411_s1 = sld [smem:[#allocation21_spill]] }
  0x17   : > { %1410 = sst [smem:[#allocation20_spill]] %s1193_s6  ;;  %s257_s11 = scalar_lea.vmem [#allocation5], %s1183_s28 }
  0x18   : > { %s264_s12 = sshll.u32 %s257_s11, 4  ;;  %s1201_s13 = scalar_lea.sflag [#allocation6], %s253_s7  ;;  %s265_s12 = int_to_ptr.vmem [resolvable:$true] %s264_s12 }
  0x19   : > { %p1402_p7 = pneg %p1188_p6  ;;  %s882_s14 = scalar_lea.vmem %s265_s12, 128 }
  0x1a   : > { %p883_p8 = scmp.ne.s32.totalorder %s265_s12, %s882_s14  ;;  %s1099_s15 = smov [#allocation5]  }
  0x1b   : > { %s887_s16 = sshll.u32 %s1099_s15, 4  ;;  %s888_s16 = int_to_ptr.vmem [resolvable:$false] %s887_s16 }
  0x1c   : > { %s262_s10 = scalar_lea.hbm %s1411_s1, %s1186_s29  ;;  %p885_p9 = pnand %p883_p8, %p1402_p7 }
  0x1d   : > { %s889_s17 = scalar_lea.vmem %s888_s16, 256  ;;  %p890_p11 = scmp.lt.s32.totalorder %s265_s12, %s888_s16 }
  0x1e   : > { %p886_p10 = pneg %p885_p9  ;;  %p891_p12 = scmp.lt.s32.totalorder %s889_s17, %s882_s14 }
  0x20   : > { %p892_p13 = por %p891_p12, %p890_p11 }
  0x22   : > { %p893_p0 = pnand %p892_p13, %p886_p10 }
  0x24   : > { %896 = shalt.err (!%p893_p0)
}
  0x25   : > { %799 = dma.hbm_to_vmem [thread:$0]  (!%p1188_p6), %s262_s10, 128, %s265_s12, %s1201_s13  }
  0x26   : > { %s1212_s25 = sadd.s32 4294967295, %s1097_s23   ;;  %s735_s26 = sadd.s32 4294967294, %s1097_s23  }
  0x27   : > { %p63_p2 = scmp.ne.s32.totalorder %s1081_s19, %s1077_s18  ;;  %p1401_p3 = scmp.eq.s32.totalorder %s1212_s25, 0 }
  0x28   : > { %p167_p4 = scmp.eq.s32.totalorder %s1212_s25, 7  ;;  %p173_p5 = scmp.eq.s32.totalorder %s735_s26, 7 }
  0x29   : > { %p736_p8 = scmp.ge.s32.totalorder %s1097_s23, 1  ;;  %p1222_p9 = por %p1401_p3, %p63_p2 }
  0x2a   : > { %p1229_p10 = por %p167_p4, %p57_p1  ;;  %p1233_p11 = por %p173_p5, %p63_p2 }
  0x2b   : > { %s1412_s7 = scalar_select %p1222_p9, 1, 0 }
  0x2c   : > { %s1413_s8 = scalar_select %p1229_p10, 1, 0 }
  0x2d   : > { %s1414_s9 = scalar_select %p1233_p11, 1, 0 }
  0x2e   : > { %p208_p12 = scmp.lt.s32.totalorder %s1097_s23, 9  ;;  %s1100_s11 = smov [#allocation8]  }
  0x2f   : > { %s223_s12 = sshll.u32 %s1100_s11, 4  ;;  %s244_s16 = scalar_lea.hbm %s1392_s0, %s1186_s29  ;;  %s1242_s12 = int_to_ptr.vmem [resolvable:$true] %s223_s12 }
  0x30   : > { %p1238_p13 = pnand %p736_p8, %p208_p12  ;;  %s238_s17 = scalar_lea.vmem [#allocation2], %s1183_s28 }
  0x31   : > { %s246_s26 = sshll.u32 %s238_s17, 4  ;;  %s1417_s1 = sand.u32 1, %s1085_s20   ;;  %s247_s26 = int_to_ptr.vmem [resolvable:$true] %s246_s26 }
  0x32   : > { %s1415_s10 = scalar_select %p1238_p13, 1, 0 }
  0x33   : > { %p789_p1 = pneg %p1238_p13  ;;  %s235_s24 = scalar_lea.sflag [#allocation3], %s1417_s1 }
  0x34   : > { %s910_s22 = scalar_lea.vmem %s247_s26, 128  ;;  %s1101_s11 = smov [#allocation2]  }
  0x35   : > { %p1253_p0 = pnand %p789_p1, %p1401_p3  ;;  %p911_p2 = scmp.ne.s32.totalorder %s247_s26, %s910_s22 }
  0x36   : > { %s915_s6 = sshll.u32 %s1101_s11, 4  ;;  %s916_s6 = int_to_ptr.vmem [resolvable:$false] %s915_s6 }
  0x37   : > { %p913_p4 = pnand %p911_p2, %p1402_p7  ;;  %s917_s14 = scalar_lea.vmem %s916_s6, 256 }
  0x38   : > { %p918_p8 = scmp.lt.s32.totalorder %s247_s26, %s916_s6  ;;  %p919_p12 = scmp.lt.s32.totalorder %s917_s14, %s910_s22 }
  0x39   : > { %p914_p5 = pneg %p913_p4 }
  0x3a   : > { %p920_p11 = por %p919_p12, %p918_p8 }
  0x3c   : > { %p921_p1 = pnand %p920_p11, %p914_p5 }
  0x3e   : > { %924 = shalt.err (!%p921_p1)
}
  0x3f   : > { %796 = dma.hbm_to_vmem [thread:$0]  (!%p1188_p6), %s244_s16, 128, %s247_s26, %s235_s24  }
  0x40   : > { %p927_p3 = pneg %p1253_p0  ;;  %s936_s1 = scalar_lea.vmem %s1242_s12, 128 }
  0x41   : > { %p937_p2 = scmp.ne.s32.totalorder %s1242_s12, %s936_s1  ;;  %p944_p10 = scmp.lt.s32.totalorder %s1242_s12, %s1242_s12 }
  0x42   : > { %p945_p9 = scmp.lt.s32.totalorder %s936_s1, %s936_s1 }
  0x43   : > { %p939_p4 = pnand %p937_p2, %p927_p3 }
  0x44   : > { %p946_p13 = por %p945_p9, %p944_p10 }
  0x45   : > { %p940_p7 = pneg %p939_p4 }
  0x47   : > { %p947_p8 = pnand %p946_p13, %p940_p7 }
  0x49   : > { %950 = shalt.err (!%p947_p8)
}
  0x4a   : > { %792 = dma.hbm_to_vmem [thread:$0]  (!%p1253_p0), %s1395_s3, 128, %s1242_s12, [#allocation9]  }
  0x4b   : > { %s280_s16 = scalar_lea.hbm %s1394_s2, %s1186_s29  ;;  %s275_s17 = scalar_lea.vmem [#allocation7], %s1183_s28 }
  0x4c   : > { %s282_s26 = sshll.u32 %s275_s17, 4  ;;  %p1418_p3 = pneg %p1188_p6  ;;  %s283_s26 = int_to_ptr.vmem [resolvable:$true] %s282_s26 }
  0x4d   : > { %s964_s11 = scalar_lea.vmem %s283_s26, 128  ;;  %s1102_s27 = smov [#allocation7]  }
  0x4e   : > { %p965_p7 = scmp.ne.s32.totalorder %s283_s26, %s964_s11  ;;  %s969_s14 = sshll.u32 %s1102_s27, 4  ;;  %s970_s14 = int_to_ptr.vmem [resolvable:$false] %s969_s14 }
  0x4f   : > { %s971_s1 = scalar_lea.vmem %s970_s14, 256  ;;  %p972_p11 = scmp.lt.s32.totalorder %s283_s26, %s970_s14 }
  0x50   : > { %p967_p9 = pnand %p965_p7, %p1418_p3  ;;  %p973_p13 = scmp.lt.s32.totalorder %s971_s1, %s964_s11 }
  0x52   : > { %p968_p10 = pneg %p967_p9  ;;  %p974_p0 = por %p973_p13, %p972_p11 }
  0x54   : > { %p975_p5 = pnand %p974_p0, %p968_p10 }
  0x56   : > { %978 = shalt.err (!%p975_p5)
}
  0x57   : > { %802 = dma.hbm_to_vmem [thread:$0]  (!%p1188_p6), %s280_s16, 128, %s283_s26, %s1201_s13  }
  0x58   : > { %p1419_p12 = scmp.ne.s32.totalorder %s1415_s10, 0 }
  0x59   : > { %s1290_s28 = sand.u32 (!%p1419_p12), 1, %s1081_s19   ;;  %p1420_p1 = scmp.ne.s32.totalorder (!%p1419_p12), %s1412_s7, 0 }
  0x5a   : > { %291 = sbr.rel (%p1419_p12) target bundleno = 821 (0x335), region = 36  ;;  %s1293_s29 = sshll.u32 (!%p1419_p12), %s1290_s28, 3 }
  0x5b   : > { %s294_s12 = scalar_lea.sflag (!%p1419_p12), [#allocation3], %s1290_s28  ;;  %s297_s22 = scalar_lea.vmem (!%p1419_p12), [#allocation2], %s1293_s29 }
  0x5f   : > { %1056 = dma.done.wait (%p1420_p1), %s294_s12, 128  }
  0x60   : > { %1058 = vsyncadd (%p1420_p1), %s294_s12, 4294967168  ;;  %s302_s30 = sand.u32 1, %s1212_s25   ;;  %s306_s10 = scalar_lea.vmem [#allocation5], %s1293_s29 }
  0x61   : > { %s303_s13 = scalar_lea.sflag [#allocation6], %s302_s30 }
  0x62   : > { %1060 = dma.done.wait (%p1420_p1), %s303_s13, 256  }
  0x63   : > { %1062 = vsyncadd (%p1420_p1), %s303_s13, 4294967040  ;;  %s315_s6 = scalar_lea.vmem [#allocation7], %s1293_s29  ;;  %p1421_p6 = scmp.eq.s32.totalorder %s1212_s25, 0 }
  0x65   : > { %1064 = dma.done.wait (%p1421_p6), [#allocation9], 128   ;;  %p1422_p2 = pmov %p1421_p6 }
  0x66   : > { %v1103_v0 = vmov 0.0   ;;  %vm1104_vm0 = vmmov 0   ;;  %vm366_vm1 = vcmask 261120   ;;  %v362_v1 = vld [vmem:[%s306_s10] sm:$0xff]  ;;  %v361_v2 = vld [vmem:[%s297_s22] sm:$0xff]  ;;  %vm445_vm3 = vcmask 64512  }
  0x67   : > { %1066 = vsyncadd (%p1422_p2), [#allocation9], 4294967168  ;;  %765 = vmatprep.subr.mxu0 %v1103_v0  ;;  %767 = vmatprep.mubr.msk.f32.mxu0 %vm1104_vm0, %v1103_v0  ;;  %v365_v3 = vmul.f32 0.17677669, %v361_v2  ;;  %v364_v4 = vld [vmem:[#allocation8] sm:$0xff]  ;;  %v363_v14 = vld [vmem:[%s315_s6] sm:$0xff] }
  0x68   : > { %770 = vmatprep.subr.mxu1 %v1103_v0  ;;  %772 = vmatprep.mubr.msk.f32.mxu1 %vm1104_vm0, %v1103_v0  ;;  %vm443_vm2 = vcmp.eq.s32.totalorder %v364_v4, 0  ;;  %s360_s25 = scalar_lea.vmem [#allocation11], %s1293_s29  ;;  %s757_s7 = sshll.u32 %s1089_s21, 7 }
  0x69   : > { %766 = vmatpush3.xpose.msk.msra.mxu0 %vm366_vm1, %v362_v1  ;;  %771 = vmatpush3.msra.mxu1 %v363_v14  ;;  %s564_s16 = scalar_lea.hbm %s1397_s5, %s757_s7  ;;  %s566_s17 = sshll.u32 %s360_s25, 4  ;;  %s567_s17 = int_to_ptr.vmem [resolvable:$true] %s566_s17 }
  0x6a   : > { %s538_s26 = scalar_lea.sflag [#allocation12], %s1290_s28  ;;  %s979_s11 = scalar_lea.vmem %s567_s17, 128 }
  0x6b   : > { %p980_p4 = scmp.ne.s32.totalorder %s567_s17, %s979_s11  ;;  %p1423_p8 = scmp.ne.s32.totalorder %s1413_s8, 0 }
  0x6c   : > { %768 = vmatmul.mubr.msk.f32.vlgmr.msra.gmra.mxu0 %vm366_vm1, %v365_v3  ;;  %s1105_s27 = smov [#allocation11]  }
  0x6d   : > { %p981_p7 = pnand %p980_p4, %p1423_p8  ;;  %s983_s14 = sshll.u32 %s1105_s27, 4  ;;  %s984_s14 = int_to_ptr.vmem [resolvable:$false] %s983_s14 }
  0x6e   : > { %s985_s1 = scalar_lea.vmem %s984_s14, 256  ;;  %p986_p9 = scmp.lt.s32.totalorder %s567_s17, %s984_s14 }
  0x6f   : > { %p982_p3 = pneg %p981_p7  ;;  %p987_p10 = scmp.lt.s32.totalorder %s985_s1, %s979_s11 }
  0x71   : > { %p988_p11 = por %p987_p10, %p986_p9 }
  0x73   : > { %p989_p13 = pnand %p988_p11, %p982_p3 }
 0x12c   : > { %v439_v5 = vpop.f32.mrf.mxu0 }
 0x12d   : > { %v444_v6 = vsel %vm443_vm2, -1e+09, %v439_v5 }
 0x12e   : > { %v769_v7 = vpop.f32.mrf.mxu0  ;;  %v446_v8 = vsel %vm445_vm3, %v444_v6, -inf }
 0x12f   : > { %447 = vmax.xlane.f32.xlu0 %v446_v8 }
 0x1b8   : > { %v448_v9 = vpop.xlane.xlu0 %447 }
 0x1b9   : > { %v449_v10 = vsub.f32 %v444_v6, %v448_v9 }
 0x1bb   : > { %v450_v11 = vmul.f32 1.442695, %v449_v10 }
 0x1bd   : > { %865 = vpow2.f32 %v450_v11 }
 0x1ca   : > { %v866_v12 = vpop.eup %865 }
 0x1cb   : > { %v452_v13 = vsel %vm445_vm3, %v866_v12, 0.0 }
 0x1cc   : > { %453 = vadd.xlane.f32.xlu0 %v452_v13 }
 0x255   : > { %v454_v15 = vpop.xlane.xlu0 %453 }
 0x256   : > { %867 = vrcp.f32 %v454_v15 }
 0x263   : > { %v868_v16 = vpop.eup %867 }
 0x264   : > { %v456_v17 = vmul.f32 %v868_v16, %v866_v12 }
 0x266   : > { %773 = vmatmul.mubr.msk.f32.vlgmr.msra.gmra.mxu1 %vm445_vm3, %v456_v17  ;;  %457 = vst.msk [vmem:[%s360_s25] sm:$0xff] %vm445_vm3, %v456_v17 }
 0x267   : > { %992 = shalt.err (!%p989_p13)
}
 0x268   : > { %s993_s12 = scalar_lea.hbm %s564_s16, 128  ;;  %s997_s13 = scalar_lea.hbm %s1397_s5, 1024 }
 0x269   : > { %p994_p0 = scmp.ne.s32.totalorder %s564_s16, %s993_s12  ;;  %p998_p1 = scmp.lt.s32.totalorder %s564_s16, %s1397_s5 }
 0x26a   : > { %p999_p6 = scmp.lt.s32.totalorder %s997_s13, %s993_s12 }
 0x26b   : > { %p995_p5 = pnand %p994_p0, %p1423_p8 }
 0x26c   : > { %p1000_p2 = por %p999_p6, %p998_p1 }
 0x26d   : > { %p996_p12 = pneg %p995_p5 }
 0x26f   : > { %p1001_p4 = pnand %p1000_p2, %p996_p12 }
 0x271   : > { %1004 = shalt.err (!%p1001_p4)
}
 0x272   : > { %786 = dma.vmem_to_hbm [thread:$0]  (%p1423_p8), %s567_s17, 128, %s564_s16, %s538_s26  }
 0x273   : > { %s353_s25 = scalar_lea.vmem [#allocation10], %s1293_s29  ;;  %s1344_s27 = scalar_lea.hbm %s1396_s4, %s757_s7 }
 0x274   : > { %s552_s24 = sshll.u32 %s353_s25, 4  ;;  %s533_s14 = scalar_lea.sflag [#allocation4], %s1290_s28  ;;  %s1346_s24 = int_to_ptr.vmem [resolvable:$true] %s552_s24 }
 0x275   : > { %s1005_s1 = scalar_lea.vmem %s1346_s24, 128  ;;  %s1106_s21 = smov [#allocation10]  }
 0x276   : > { %p1006_p7 = scmp.ne.s32.totalorder %s1346_s24, %s1005_s1  ;;  %s1009_s29 = sshll.u32 %s1106_s21, 4  ;;  %s1010_s29 = int_to_ptr.vmem [resolvable:$false] %s1009_s29 }
 0x277   : > { %s1011_s7 = scalar_lea.vmem %s1010_s29, 256  ;;  %p1012_p10 = scmp.lt.s32.totalorder %s1346_s24, %s1010_s29 }
 0x278   : > { %p1007_p3 = pnand %p1006_p7, %p1423_p8  ;;  %p1013_p11 = scmp.lt.s32.totalorder %s1011_s7, %s1005_s1 }
 0x27a   : > { %p1008_p9 = pneg %p1007_p3  ;;  %p1014_p13 = por %p1013_p11, %p1012_p10 }
 0x27c   : > { %p1015_p0 = pnand %p1014_p13, %p1008_p9 }
 0x326   : > { %v527_v18 = vpop.f32.mrf.mxu1 }
 0x327   : > { %531 = vst.msk [vmem:[%s353_s25] sm:$0xff] %vm366_vm1, %v527_v18 }
 0x328   : > { %v774_v19 = vpop.f32.mrf.mxu1 }
 0x329   : > { %1018 = shalt.err (!%p1015_p0)
}
 0x32a   : > { %s1019_s16 = scalar_lea.hbm %s1344_s27, 128  ;;  %s1023_s26 = scalar_lea.hbm %s1396_s4, 1024 }
 0x32b   : > { %p1020_p5 = scmp.ne.s32.totalorder %s1344_s27, %s1019_s16  ;;  %p1024_p6 = scmp.lt.s32.totalorder %s1344_s27, %s1396_s4 }
 0x32c   : > { %p1025_p2 = scmp.lt.s32.totalorder %s1023_s26, %s1019_s16 }
 0x32d   : > { %p1021_p12 = pnand %p1020_p5, %p1423_p8 }
 0x32e   : > { %p1026_p4 = por %p1025_p2, %p1024_p6 }
 0x32f   : > { %p1022_p1 = pneg %p1021_p12 }
 0x331   : > { %p1027_p7 = pnand %p1026_p4, %p1022_p1 }
 0x333   : > { %1030 = shalt.err (!%p1027_p7)
}
 0x334   : > { %785 = dma.vmem_to_hbm [thread:$0]  (%p1423_p8), %s1346_s24, 128, %s1344_s27, %s533_s14  }
 0x335 PF: > { %p813_p3 = scmp.ge.s32.totalorder %s1097_s23, 2  ;;  %s578_s30 = sand.u32 1, %s1077_s18  }
 0x336   : > { %p1424_p9 = scmp.ne.s32.totalorder %s1414_s9, 0  ;;  %s579_s13 = scalar_lea.sflag [#allocation4], %s578_s30 }
 0x338   : > { %p804_p10 = pnand %p813_p3, %p1424_p9 }
 0x33a   : > { %p805_p11 = pneg %p804_p10 }
 0x33c   : > { %1068 = dma.done.wait (%p805_p11), %s579_s13, 128  }
 0x33d   : > { %1070 = vsyncadd (%p805_p11), %s579_s13, 4294967168  ;;  %s588_s10 = scalar_lea.sflag [#allocation12], %s578_s30 }
 0x33e   : > { %1072 = dma.done.wait (%p805_p11), %s588_s10, 128  }
 0x33f   : > { %1074 = vsyncadd (%p805_p11), %s588_s10, 4294967168  ;;  %s29_s23 = sadd.s32 1, %s1097_s23   ;;  %s1425_s8 = sld [smem:[#allocation20_spill]] }
 0x340   : > { %p26_p13 = scmp.ge.s32.totalorder %s29_s23, 10   ;;  %s1426_s21 = sld [smem:[#allocation18_spill]] }
 0x341   : > { %s1427_s22 = sld [smem:[#allocation19_spill]]  ;;  %s1428_s18 = smov %s1081_s19 }
 0x342   : > { %s1429_s19 = smov %s1085_s20  ;;  %28 = sbr.rel (!%p26_p13) target bundleno = 13 (0xd), region = 127 }
 0x345   : > { %s1430_s20 = smov %s1425_s8 }
 0x347   :  { %593 = vsyncpa [#allocation3], 1 }
 0x348   :  { %595 = vsyncpa [#allocation3 + $0x1], 1 }
 0x349   :  { %596 = vsyncpa [#allocation6], 1 }
 0x34a   :  { %598 = vsyncpa [#allocation6 + $0x1], 1 }
 0x34b   :  { %599 = vsyncpa [#allocation9], 1 }
 0x34c   :  { %600 = vsyncpa [#allocation4], 1 }
 0x34d   :  { %602 = vsyncpa [#allocation4 + $0x1], 1 }
 0x34e   :  { %603 = vsyncpa [#allocation12], 1 }
 0x34f   :  { %605 = vsyncpa [#allocation12 + $0x1], 1 }

</bundles_post_ra>
